<compile_context>
chip_gen: v7x
topology: tpu7x:2x2x1
jax: 0.10.0
libtpu: 0.0.40
codegen_flags: <defaults>
</compile_context>

<pallas_src>
import numpy as np
import jax
import jax.numpy as jnp
from jax.experimental import pallas as pl
from jax.experimental.pallas import tpu as pltpu


# ----------------------------- Pallas kernel -------------------------------
def policy_kernel(x_ref, a_ref, bc_ref, w1_ref, w2_ref, out_ref):
    # conv1 folded to a dense (18 -> 128) map living in cols 0..127 of a_ref.
    # bc_ref adds the conv bias (cols 0..127) and seeds the "1" carrier at
    # col 128, which threads the fc1/fc2 biases (folded into w1/w2) forward.
    h0 = jnp.dot(x_ref[...], a_ref[...],
                 preferred_element_type=jnp.float32)            # (tm, 256)
    h0 = jnp.maximum(h0 + bc_ref[...], 0.0)                     # ReLU; col128 == 1
    # fc1 (bias folded via carrier) + ReLU                       (tm, 128)
    h1 = jnp.maximum(
        jnp.dot(h0, w1_ref[...], preferred_element_type=jnp.float32), 0.0)
    # fc2 (bias folded; padded logit cols 9..15 carry -1e30)      (tm, 16)
    logits = jnp.dot(h1, w2_ref[...], preferred_element_type=jnp.float32)
    # softmax over the 16-lane axis (exp(-1e30 - m) underflows exactly to 0)
    m = jnp.max(logits, axis=1, keepdims=True)
    e = jnp.exp(logits - m)
    s = jnp.sum(e, axis=1, keepdims=True)
    out_ref[...] = e * pl.reciprocal(s, approx=False)           # exact (1e-5 tol)


# --------------------------- one-time param prep ----------------------------
def prepare_params(params):
    """Fold conv->linear (im2col on the weights), fold fc1/fc2 biases via the
    ones-carrier, build the conv-bias/carrier broadcast row, and the shrunken
    (128, 16) output weight.  Pure jnp; call once, reuse across forwards."""
    conv_w = jnp.asarray(params["conv_w"], jnp.float32)   # (32, 2, 2, 2) OIHW
    conv_b = jnp.asarray(params["conv_b"], jnp.float32)   # (32,)
    fc1_w = jnp.asarray(params["fc1_w"], jnp.float32)     # (64, 128)
    fc1_b = jnp.asarray(params["fc1_b"], jnp.float32)     # (64,)
    fc2_w = jnp.asarray(params["fc2_w"], jnp.float32)     # (9, 64)
    fc2_b = jnp.asarray(params["fc2_b"], jnp.float32)     # (9,)

    # im2col fold: dense (18 -> 128) map matching torch's NCHW flatten of the
    # (32, 2, 2) conv output.  Index arrays are static numpy; values are jnp.
    o_idx, i_idx, src = [], [], []
    for c in range(32):
        for oh in range(2):
            for ow in range(2):
                for ic in range(2):
                    for kh in range(2):
                        for kw in range(2):
                            o_idx.append(c * 4 + oh * 2 + ow)
                            i_idx.append(ic * 9 + (oh + kh) * 3 + (ow + kw))
                            src.append((c, ic, kh, kw))
    o_idx = np.asarray(o_idx)
    i_idx = np.asarray(i_idx)
    src = np.asarray(src)
    vals = conv_w[src[:, 0], src[:, 1], src[:, 2], src[:, 3]]
    A = jnp.zeros((18, 128), jnp.float32).at[i_idx, o_idx].set(vals)  # (in, out)

    # Stage 1 weight: (18, 256). Cols 0..127 = folded conv map, rest zero.
    a_aug = jnp.zeros((18, 256), jnp.float32).at[:, :128].set(A)

    # Stage 1 bias/carrier row: cols 0..127 = conv bias (per output pixel,
    # matching the c*4 + oh*2 + ow ordering), col 128 = 1.0 (carrier seed).
    bc_row = jnp.zeros((1, 256), jnp.float32)
    bc_row = bc_row.at[0, :128].set(jnp.repeat(conv_b, 4))
    bc_row = bc_row.at[0, 128].set(1.0)

    # Stage 2 weight: (256, 128). Row 128 = fc1 bias; col 64 carries the "1".
    w1_aug = jnp.zeros((256, 128), jnp.float32)
    w1_aug = w1_aug.at[:128, :64].set(fc1_w.T)
    w1_aug = w1_aug.at[128, :64].set(fc1_b)
    w1_aug = w1_aug.at[128, 64].set(1.0)

    # Stage 3 weight: (128, 16). Row 64 = fc2 bias; padded logit columns get
    # -1e30 so the 16-lane softmax ignores them.
    w2_aug = jnp.zeros((128, 16), jnp.float32)
    w2_aug = w2_aug.at[:64, :9].set(fc2_w.T)
    w2_aug = w2_aug.at[64, :9].set(fc2_b)
    w2_aug = w2_aug.at[64, 9:].set(-1e30)

    return {"a": a_aug, "bc": bc_row, "w1": w1_aug, "w2": w2_aug}


# ------------------------------ jitted forward ------------------------------
def _round_up(x, m):
    return (x + m - 1) // m * m


@jax.jit
def policy_net_forward(x, prepared):
    """x: (B, 2, 3, 3) float32 -> (B, 9) softmax probabilities."""
    B = x.shape[0]
    x2d = x.reshape(B, 18).astype(jnp.float32)   # contiguous reshape (no pad/concat)

    # Tile selection: tiny batches run as one tile; otherwise split into >= 2
    # grid steps (both v7x TensorCores get work), capped at 512 rows per tile.
    if B <= 16:
        tile_m = B                                   # block dims == full dims
    else:
        tile_m = min(512, _round_up((B + 1) // 2, 8))  # multiple of 8 sublanes
    n_tiles = (B + tile_m - 1) // tile_m             # ragged last block is OK

    cost = pl.CostEstimate(
        flops=2 * B * (18 * 256 + 256 * 128 + 128 * 16),
        transcendentals=B * 16,
        bytes_accessed=4 * (B * (18 + 16) + 18 * 256 + 256 + 256 * 128 + 128 * 16),
    )

    out16 = pl.pallas_call(
        policy_kernel,
        out_shape=jax.ShapeDtypeStruct((B, 16), jnp.float32),
        grid=(n_tiles,),
        in_specs=[
            pl.BlockSpec((tile_m, 18), lambda i: (i, 0)),   # x tile (18 = full dim)
            pl.BlockSpec((18, 256), lambda i: (0, 0)),      # weights stay
            pl.BlockSpec((1, 256), lambda i: (0, 0)),       #   resident in
            pl.BlockSpec((256, 128), lambda i: (0, 0)),     #   VMEM across
            pl.BlockSpec((128, 16), lambda i: (0, 0)),      #   grid steps
        ],
        out_specs=pl.BlockSpec((tile_m, 16), lambda i: (i, 0)),
        compiler_params=pltpu.CompilerParams(
            dimension_semantics=("parallel",)),             # v7x: 2 TCs
        cost_estimate=cost,
    )(x2d, prepared["a"], prepared["bc"], prepared["w1"], prepared["w2"])

    return out16[:, :9]


# ------------------------------ reference (JAX) -----------------------------
def reference_forward(x, params):
    wc = jnp.asarray(params["conv_w"])
    bc = jnp.asarray(params["conv_b"])
    y = jax.lax.conv_general_dilated(
        x, wc, window_strides=(1, 1), padding="VALID",
        dimension_numbers=("NCHW", "OIHW", "NCHW"))
    y = jnp.maximum(y + bc[None, :, None, None], 0.0)
    y = y.reshape(x.shape[0], -1)                                  # (B, 128)
    y = jnp.maximum(y @ jnp.asarray(params["fc1_w"]).T + params["fc1_b"], 0.0)
    y = y @ jnp.asarray(params["fc2_w"]).T + params["fc2_b"]
    return jax.nn.softmax(y, axis=1)


# ---------------------------------- main ------------------------------------
if __name__ == "__main__":
    key = jax.random.PRNGKey(0)
    k_x, k_x2, k_cw, k_cb, k_1w, k_1b, k_2w, k_2b = jax.random.split(key, 8)

    # Deterministic synthetic parameters (shapes from PolicyNet.__init__).
    params = {
        "conv_w": 0.1 * jax.random.normal(k_cw, (32, 2, 2, 2), jnp.float32),
        "conv_b": 0.1 * jax.random.normal(k_cb, (32,), jnp.float32),
        "fc1_w": 0.1 * jax.random.normal(k_1w, (64, 128), jnp.float32),
        "fc1_b": 0.1 * jax.random.normal(k_1b, (64,), jnp.float32),
        "fc2_w": 0.1 * jax.random.normal(k_2w, (9, 64), jnp.float32),
        "fc2_b": 0.1 * jax.random.normal(k_2b, (9,), jnp.float32),
    }
    prepared = jax.tree.map(jax.block_until_ready, prepare_params(params))

    # Small batch consistent with the module's forward: (B, 2, 3, 3).
    x = jax.random.normal(k_x, (2, 2, 3, 3), jnp.float32)
    out = jax.block_until_ready(policy_net_forward(x, prepared))
    ref = jax.block_until_ready(reference_forward(x, params))
    np.testing.assert_allclose(np.asarray(out), np.asarray(ref), atol=1e-5, rtol=1e-5)
    assert out.shape == (2, 9)
    np.testing.assert_allclose(np.asarray(out).sum(axis=1), np.ones(2), atol=1e-5)

    # Larger batch exercising the 2-step grid + ragged last block (300 = 152+148).
    xb = jax.random.normal(k_x2, (300, 2, 3, 3), jnp.float32)
    outb = jax.block_until_ready(policy_net_forward(xb, prepared))
    refb = jax.block_until_ready(reference_forward(xb, params))
    np.testing.assert_allclose(np.asarray(outb), np.asarray(refb), atol=1e-5, rtol=1e-5)
    assert outb.shape == (300, 9)

    print("KERNEL_OK")
</pallas_src>

<mosaic_0001>
module attributes {stable_mosaic.version = 11 : i64} {
  func.func @policy_kernel(%arg0: i32, %arg1: memref<2x18xf32, #tpu.memory_space<vmem>>, %arg2: memref<18x256xf32, #tpu.memory_space<vmem>>, %arg3: memref<1x256xf32, #tpu.memory_space<vmem>>, %arg4: memref<256x128xf32, #tpu.memory_space<vmem>>, %arg5: memref<128x16xf32, #tpu.memory_space<vmem>>, %arg6: memref<2x16xf32, #tpu.memory_space<vmem>>) attributes {dimension_semantics = [#tpu.dimension_semantics<parallel>], iteration_bounds = array<i64: 1>, scalar_prefetch = 0 : i64, scratch_operands = 0 : i64, tpu.core_type = #tpu.core_type<tc>, window_params = [{transform_indices = @transform_0, window_bounds = array<i64: 2, 18>}, {pipeline_mode = #tpu.pipeline_mode<synchronous>, transform_indices = @transform_1, window_bounds = array<i64: 18, 256>}, {pipeline_mode = #tpu.pipeline_mode<synchronous>, transform_indices = @transform_2, window_bounds = array<i64: 1, 256>}, {pipeline_mode = #tpu.pipeline_mode<synchronous>, transform_indices = @transform_3, window_bounds = array<i64: 256, 128>}, {pipeline_mode = #tpu.pipeline_mode<synchronous>, transform_indices = @transform_4, window_bounds = array<i64: 128, 16>}, {transform_indices = @transform_5, window_bounds = array<i64: 2, 16>}]} {
    %c0 = arith.constant 0 : index
    %c0_0 = arith.constant 0 : index
    %0 = vector.load %arg1[%c0, %c0_0] : memref<2x18xf32, #tpu.memory_space<vmem>>, vector<2x18xf32>
    %c0_1 = arith.constant 0 : index
    %c0_2 = arith.constant 0 : index
    %1 = vector.load %arg2[%c0_1, %c0_2] : memref<18x256xf32, #tpu.memory_space<vmem>>, vector<18x256xf32>
    %cst = arith.constant dense<0.000000e+00> : vector<2x256xf32>
    %2 = tpu.matmul %0, %1, %cst {dimension_numbers = #tpu.dot_dimension_numbers<[1], [0], [0], [1], [0, 0, 1, 1], [], []>} : vector<2x18xf32>, vector<18x256xf32>, vector<2x256xf32> -> vector<2x256xf32>
    %c0_3 = arith.constant 0 : index
    %c0_4 = arith.constant 0 : index
    %3 = vector.load %arg3[%c0_3, %c0_4] : memref<1x256xf32, #tpu.memory_space<vmem>>, vector<1x256xf32>
    %4 = vector.broadcast %3 : vector<1x256xf32> to vector<2x256xf32>
    %5 = arith.addf %2, %4 : vector<2x256xf32>
    %cst_5 = arith.constant 0.000000e+00 : f32
    %6 = vector.broadcast %cst_5 : f32 to vector<2x256xf32>
    %7 = arith.maximumf %5, %6 : vector<2x256xf32>
    %c0_6 = arith.constant 0 : index
    %c0_7 = arith.constant 0 : index
    %8 = vector.load %arg4[%c0_6, %c0_7] : memref<256x128xf32, #tpu.memory_space<vmem>>, vector<256x128xf32>
    %cst_8 = arith.constant dense<0.000000e+00> : vector<2x128xf32>
    %9 = tpu.matmul %7, %8, %cst_8 {dimension_numbers = #tpu.dot_dimension_numbers<[1], [0], [0], [1], [0, 0, 1, 1], [], []>} : vector<2x256xf32>, vector<256x128xf32>, vector<2x128xf32> -> vector<2x128xf32>
    %cst_9 = arith.constant 0.000000e+00 : f32
    %10 = vector.broadcast %cst_9 : f32 to vector<2x128xf32>
    %11 = arith.maximumf %9, %10 : vector<2x128xf32>
    %c0_10 = arith.constant 0 : index
    %c0_11 = arith.constant 0 : index
    %12 = vector.load %arg5[%c0_10, %c0_11] : memref<128x16xf32, #tpu.memory_space<vmem>>, vector<128x16xf32>
    %cst_12 = arith.constant dense<0.000000e+00> : vector<2x16xf32>
    %13 = tpu.matmul %11, %12, %cst_12 {dimension_numbers = #tpu.dot_dimension_numbers<[1], [0], [0], [1], [0, 0, 1, 1], [], []>} : vector<2x128xf32>, vector<128x16xf32>, vector<2x16xf32> -> vector<2x16xf32>
    %cst_13 = arith.constant dense<0xFF800000> : vector<2xf32>
    %14 = vector.multi_reduction <maximumf>, %13, %cst_13 [1] : vector<2x16xf32> to vector<2xf32>
    %15 = vector.shape_cast %14 : vector<2xf32> to vector<2x1xf32>
    %16 = vector.broadcast %15 : vector<2x1xf32> to vector<2x16xf32>
    %17 = arith.subf %13, %16 : vector<2x16xf32>
    %18 = math.exp %17 : vector<2x16xf32>
    %cst_14 = arith.constant dense<0.000000e+00> : vector<2xf32>
    %19 = vector.multi_reduction <add>, %18, %cst_14 [1] : vector<2x16xf32> to vector<2xf32>
    %20 = vector.shape_cast %19 : vector<2xf32> to vector<2x1xf32>
    %21 = tpu.reciprocal %20 : vector<2x1xf32> -> vector<2x1xf32>
    %22 = vector.broadcast %21 : vector<2x1xf32> to vector<2x16xf32>
    %23 = arith.mulf %18, %22 : vector<2x16xf32>
    %c0_15 = arith.constant 0 : index
    %c0_16 = arith.constant 0 : index
    %24 = vector.load %arg6[%c0_15, %c0_16] : memref<2x16xf32, #tpu.memory_space<vmem>>, vector<2x16xf32>
    tpu.vector_store %arg6[%c0_15, %c0_16], %23 {strides = array<i32>} : memref<2x16xf32, #tpu.memory_space<vmem>>, vector<2x16xf32>,
    return
  }
  func.func @transform_0(%arg0: i32) -> (i32, i32) {
    %c0_i32 = arith.constant 0 : i32
    %c0_i32_0 = arith.constant 0 : i32
    return %arg0, %c0_i32 : i32, i32
  }
  func.func @transform_1(%arg0: i32) -> (i32, i32) {
    %c0_i32 = arith.constant 0 : i32
    %c0_i32_0 = arith.constant 0 : i32
    %c0_i32_1 = arith.constant 0 : i32
    return %c0_i32, %c0_i32_0 : i32, i32
  }
  func.func @transform_2(%arg0: i32) -> (i32, i32) {
    %c0_i32 = arith.constant 0 : i32
    %c0_i32_0 = arith.constant 0 : i32
    %c0_i32_1 = arith.constant 0 : i32
    return %c0_i32, %c0_i32_0 : i32, i32
  }
  func.func @transform_3(%arg0: i32) -> (i32, i32) {
    %c0_i32 = arith.constant 0 : i32
    %c0_i32_0 = arith.constant 0 : i32
    %c0_i32_1 = arith.constant 0 : i32
    return %c0_i32, %c0_i32_0 : i32, i32
  }
  func.func @transform_4(%arg0: i32) -> (i32, i32) {
    %c0_i32 = arith.constant 0 : i32
    %c0_i32_0 = arith.constant 0 : i32
    %c0_i32_1 = arith.constant 0 : i32
    return %c0_i32, %c0_i32_0 : i32, i32
  }
  func.func @transform_5(%arg0: i32) -> (i32, i32) {
    %c0_i32 = arith.constant 0 : i32
    %c0_i32_0 = arith.constant 0 : i32
    return %arg0, %c0_i32 : i32, i32
  }
}

</mosaic_0001>

<bundles_post_ra>
// kernel: policy_net_forward.1
= control target key start
LH: loop header
LB: loop body
LE: loop exit
PB: predicated region body
PF: predicated region fallthrough
CT: control target
= control target key end

     0   :  { %10 = vsyncpa [#allocation3], 0  ;;  %s704_s0 = inlined_call_operand.vmem [shape: f32[2,18], index: 0, kind: input, shape index: {}]   ;;  %s705_s1 = inlined_call_operand.vmem [shape: f32[18,256], index: 1, kind: input, shape index: {}]   ;;  %s706_s2 = inlined_call_operand.vmem [shape: f32[1,256], index: 2, kind: input, shape index: {}]   ;;  %s707_s3 = inlined_call_operand.hbm [shape: f32[256,128], index: 3, kind: input, shape index: {}]   ;;  %s708_s4 = inlined_call_operand.vmem [shape: f32[128,16], index: 4, kind: input, shape index: {}]   ;;  %s709_s5 = inlined_call_operand.hbm [shape: f32[2,16], index: 5, kind: output, shape index: {}]  }
   0x1   :  { %11 = vsyncpa [#allocation4], 0  ;;  %s564_s18 = smov [#allocation2]   ;;  %s516_s22 = scalar_lea.hbm %s707_s3, 4096 }
   0x2   :  { %s23_s19 = sshll.u32 %s564_s18, 4  ;;  %p517_p0 = scmp.ne.s32.totalorder %s707_s3, %s516_s22  ;;  %s24_s19 = int_to_ptr.vmem [resolvable:$true] %s23_s19 }
   0x3   :  { %p520_p1 = scmp.lt.u32.totalorder %s516_s22, %s707_s3 }
   0x5   :  { %p522_p2 = pnand %p520_p1, %p517_p0 }
   0x7   :  { %525 = shalt.err (!%p522_p2)
}
   0x8   :  { %s526_s27 = scalar_lea.vmem %s24_s19, 4096  ;;  %p531_p4 = scmp.lt.s32.totalorder %s24_s19, %s24_s19 }
   0x9   :  { %p527_p3 = scmp.ne.s32.totalorder %s24_s19, %s526_s27  ;;  %p532_p5 = scmp.lt.s32.totalorder %s526_s27, %s526_s27 }
   0xb   :  { %p533_p6 = por %p532_p5, %p531_p4 }
   0xd   :  { %p534_p7 = pnand %p533_p6, %p527_p3 }
   0xf   :  { %537 = shalt.err (!%p534_p7)
}
  0x10   :  { %s565_s28 = smov 128   ;;  %s566_s29 = smov 8  }
  0x11   :  { %29 = dma.hbm_to_vmem [thread:$0]  %s707_s3, 4096, %s24_s19, [#allocation3], %s565_s28, %s565_s28, %s566_s29  }
  0x12   :  { %560 = dma.done.wait [#allocation3], 4096  }
  0x13   :  { %561 = vsyncadd [#allocation3], 4294963200  ;;  %v567_v0 = vmov 0.0   ;;  %v37_v1 = vld [vmem:[%s705_s1 + $0x8] sm:$0xff]  ;;  %v39_v2 = vld [vmem:[%s705_s1 + $0x18] sm:$0xff]  ;;  %vm58_vm0 = vcmask 1041408  }
  0x14   :  { %129 = vmatprep.mubr.f32.mxu0 %v567_v0  ;;  %v36_v3 = vld [vmem:[%s705_s1] sm:$0xff]  ;;  %v445_v4 = vpack.c.bf16 %v39_v2, %v37_v1  ;;  %v38_v5 = vld [vmem:[%s705_s1 + $0x10] sm:$0xff]  ;;  %v41_v7 = vld [vmem:[%s705_s1 + $0x28] sm:$0x3]  ;;  %vm54_vm1 = vcmask 146432   ;;  %v568_v61 = vmov 0.0|0.0  }
  0x15   :  { %v447_v6 = vpack.c.bf16 %v38_v5, %v36_v3  ;;  %v154_v8 = vld [vmem:[#allocation2 + $0x80] sm:$0xff]  ;;  %v155_v9 = vld [vmem:[#allocation2 + $0x88] sm:$0xff]  ;;  %v156_v13 = vld [vmem:[#allocation2 + $0x90] sm:$0xff]  ;;  %vm569_vm2 = vmmov 0   ;;  %vm327_vm3 = vcmask 123904  }
  0x16   :  { %446 = vmatprep.subr.bf16.mxu0 %v445_v4  ;;  %v449_v10 = vpack.c.bf16 %v155_v9, %v154_v8  ;;  %v138_v11 = vld [vmem:[#allocation2] sm:$0xff]  ;;  %v139_v12 = vld [vmem:[#allocation2 + $0x8] sm:$0xff]  ;;  %v157_v15 = vld [vmem:[#allocation2 + $0x98] sm:$0xff] }
  0x17   :  { %448 = vmatpush1.bf16.msra.mxu0 %v447_v6  ;;  %v451_v14 = vpack.c.bf16 %v139_v12, %v138_v11  ;;  %v140_v16 = vld [vmem:[#allocation2 + $0x10] sm:$0xff]  ;;  %v141_v17 = vld [vmem:[#allocation2 + $0x18] sm:$0xff]  ;;  %v40_v18 = vld [vmem:[%s705_s1 + $0x20] sm:$0x3]  ;;  %v453_v19 = vpack.c.bf16 %v157_v15, %v156_v13 }
  0x18   :  { %355 = vmatprep.subr.msk.mxu0 %vm58_vm0, %v41_v7  ;;  %450 = vmatprep.subr.bf16.mxu1 %v449_v10  ;;  %v158_v20 = vld [vmem:[#allocation2 + $0xa0] sm:$0xff]  ;;  %v159_v21 = vld [vmem:[#allocation2 + $0xa8] sm:$0xff]  ;;  %v455_v23 = vpack.c.bf16 %v141_v17, %v140_v16  ;;  %v160_v27 = vld [vmem:[#allocation2 + $0xb0] sm:$0xff]  ;;  %v44_v17 = vlaneseq }
  0x19   :  { %v35_v22 = vld [vmem:[%s704_s0] sm:$0x3]  ;;  %452 = vmatpush3.bf16.msra.mxu1 %v451_v14  ;;  %v457_v24 = vpack.c.bf16 %v159_v21, %v158_v20  ;;  %v143_v26 = vld [vmem:[#allocation2 + $0x28] sm:$0xff]  ;;  %v161_v28 = vld [vmem:[#allocation2 + $0xb8] sm:$0xff] }
  0x1a   :  { %454 = vmatprep.subr.bf16.mxu1 %v453_v19  ;;  %v142_v25 = vld [vmem:[#allocation2 + $0x20] sm:$0xff]  ;;  %v461_v30 = vpack.c.bf16 %v161_v28, %v160_v27  ;;  %v144_v31 = vld [vmem:[#allocation2 + $0x30] sm:$0xff]  ;;  %v145_v32 = vld [vmem:[#allocation2 + $0x38] sm:$0xff] }
  0x1b   :  { %356 = vmatpush1.msk.msra.mxu0 %vm58_vm0, %v40_v18  ;;  %v459_v29 = vpack.c.bf16 %v143_v26, %v142_v25  ;;  %v162_v33 = vld [vmem:[#allocation2 + $0xc0] sm:$0xff]  ;;  %v163_v34 = vld [vmem:[#allocation2 + $0xc8] sm:$0xff]  ;;  %v463_v35 = vpack.c.bf16 %v145_v32, %v144_v31  ;;  %v164_v39 = vld [vmem:[#allocation2 + $0xd0] sm:$0xff]  ;;  %v45_v18 = vshrl.u32 %v44_v17, 7 }
  0x1c   :  { %357 = vmatmul.mubr.msk.f32.vlgmr.msra.gmra.mrb[0].mxu0 %vm54_vm1, %v35_v22  ;;  %v465_v36 = vpack.c.bf16 %v163_v34, %v162_v33  ;;  %v146_v37 = vld [vmem:[#allocation2 + $0x40] sm:$0xff]  ;;  %v147_v38 = vld [vmem:[#allocation2 + $0x48] sm:$0xff]  ;;  %v165_v40 = vld [vmem:[#allocation2 + $0xd8] sm:$0xff]  ;;  %481 = vmatprep.subr.bf16.mxu0 %v568_v61 }
  0x1d   :  { %456 = vmatpush3.bf16.msra.mxu1 %v455_v23  ;;  %v467_v41 = vpack.c.bf16 %v147_v38, %v146_v37  ;;  %v469_v42 = vpack.c.bf16 %v165_v40, %v164_v39  ;;  %v148_v43 = vld [vmem:[#allocation2 + $0x50] sm:$0xff]  ;;  %v149_v44 = vld [vmem:[#allocation2 + $0x58] sm:$0xff]  ;;  %v166_v45 = vld [vmem:[#allocation2 + $0xe0] sm:$0xff]  ;;  %v46_v19 = vsub.s32 0, %v45_v18  ;;  %v50_v21 = vsub.s32 1, %v45_v18  ;;  %442 = vmatprep.mubr.msk.f32.mxu0 %vm569_vm2, %v567_v0 }
  0x1e   :  { %458 = vmatprep.subr.bf16.mxu1 %v457_v24  ;;  %v167_v46 = vld [vmem:[#allocation2 + $0xe8] sm:$0xff]  ;;  %v471_v47 = vpack.c.bf16 %v149_v44, %v148_v43  ;;  %v150_v49 = vld [vmem:[#allocation2 + $0x60] sm:$0xff]  ;;  %v168_v52 = vld [vmem:[#allocation2 + $0xf0] sm:$0xff] }
  0x1f   :  { %v473_v48 = vpack.c.bf16 %v167_v46, %v166_v45  ;;  %v151_v50 = vld [vmem:[#allocation2 + $0x68] sm:$0xff]  ;;  %v169_v53 = vld [vmem:[#allocation2 + $0xf8] sm:$0xff]  ;;  %v152_v55 = vld [vmem:[#allocation2 + $0x70] sm:$0xff] }
  0x20   :  { %v475_v51 = vpack.c.bf16 %v151_v50, %v150_v49  ;;  %v477_v54 = vpack.c.bf16 %v169_v53, %v168_v52  ;;  %v153_v56 = vld [vmem:[#allocation2 + $0x78] sm:$0xff]  ;;  %v241_v58 = vld [vmem:[%s708_s4] sm:$0xff]  ;;  %v242_v59 = vld [vmem:[%s708_s4 + $0x8] sm:$0xff] }
  0x21   :  { %460 = vmatpush3.bf16.msra.mxu1 %v459_v29  ;;  %v479_v57 = vpack.c.bf16 %v153_v56, %v152_v55  ;;  %v243_v60 = vld [vmem:[%s708_s4 + $0x10] sm:$0xff]  ;;  %v482_v62 = vpack.c.bf16 %v242_v59, %v241_v58  ;;  %v244_v63 = vld [vmem:[%s708_s4 + $0x18] sm:$0xff]  ;;  %v245_v2 = vld [vmem:[%s708_s4 + $0x20] sm:$0xff] }
  0x22   :  { %462 = vmatprep.subr.bf16.mxu1 %v461_v30  ;;  %v485_v1 = vpack.c.bf16 %v244_v63, %v243_v60  ;;  %v246_v3 = vld [vmem:[%s708_s4 + $0x28] sm:$0xff]  ;;  %v247_v5 = vld [vmem:[%s708_s4 + $0x30] sm:$0xff]  ;;  %v248_v6 = vld [vmem:[%s708_s4 + $0x38] sm:$0xff] }
  0x23   :  { %483 = vmatpush3.bf16.msra.mxu0 %v482_v62  ;;  %v488_v4 = vpack.c.bf16 %v246_v3, %v245_v2  ;;  %v491_v7 = vpack.c.bf16 %v248_v6, %v247_v5  ;;  %v249_v8 = vld [vmem:[%s708_s4 + $0x40] sm:$0xff]  ;;  %v250_v9 = vld [vmem:[%s708_s4 + $0x48] sm:$0xff]  ;;  %v251_v11 = vld [vmem:[%s708_s4 + $0x50] sm:$0xff] }
  0x24   :  { %484 = vmatprep.subr.bf16.mxu0 %v568_v61  ;;  %v494_v10 = vpack.c.bf16 %v250_v9, %v249_v8  ;;  %v252_v12 = vld [vmem:[%s708_s4 + $0x58] sm:$0xff]  ;;  %v253_v14 = vld [vmem:[%s708_s4 + $0x60] sm:$0xff]  ;;  %v254_v15 = vld [vmem:[%s708_s4 + $0x68] sm:$0xff] }
  0x25   :  { %464 = vmatpush3.bf16.msra.mxu1 %v463_v35  ;;  %v497_v13 = vpack.c.bf16 %v252_v12, %v251_v11  ;;  %v500_v16 = vpack.c.bf16 %v254_v15, %v253_v14  ;;  %v42_v20 = vld [vmem:[%s706_s2] sm:$0x3]  ;;  %v255_v30 = vld [vmem:[%s708_s4 + $0x70] sm:$0xff]  ;;  %v256_v31 = vld [vmem:[%s708_s4 + $0x78] sm:$0xff]  ;;  %s570_s2 = smov [#allocation5]  }
  0x26   :  { %466 = vmatprep.subr.bf16.mxu1 %v465_v36  ;;  %v47_v22 = vrot.slane %v42_v20, %v46_v19  ;;  %v51_v23 = vrot.slane %v42_v20, %v50_v21  ;;  %v503_v32 = vpack.c.bf16 %v256_v31, %v255_v30  ;;  %s346_s4 = sshll.u32 %s570_s2, 4  ;;  %s347_s4 = int_to_ptr.vmem [resolvable:$true] %s346_s4 }
  0x27   :  { %486 = vmatpush3.bf16.msra.mxu0 %v485_v1  ;;  %s538_s24 = scalar_lea.vmem %s347_s4, 32  ;;  %p543_p9 = scmp.lt.s32.totalorder %s347_s4, %s347_s4 }
  0x28   :  { %487 = vmatprep.subr.bf16.mxu0 %v568_v61  ;;  %p539_p8 = scmp.ne.s32.totalorder %s347_s4, %s538_s24  ;;  %p544_p10 = scmp.lt.s32.totalorder %s538_s24, %s538_s24 }
  0x29   :  { %468 = vmatpush3.bf16.msra.mxu1 %v467_v41 }
  0x2a   :  { %470 = vmatprep.subr.bf16.mxu1 %v469_v42  ;;  %p545_p11 = por %p544_p10, %p543_p9 }
  0x2b   :  { %489 = vmatpush3.bf16.msra.mxu0 %v488_v4 }
  0x2c   :  { %490 = vmatprep.subr.bf16.mxu0 %v568_v61  ;;  %p546_p12 = pnand %p545_p11, %p539_p8 }
  0x2d   :  { %472 = vmatpush3.bf16.msra.mxu1 %v471_v47 }
  0x2e   :  { %474 = vmatprep.subr.bf16.mxu1 %v473_v48 }
  0x2f   :  { %492 = vmatpush3.bf16.msra.mxu0 %v491_v7 }
  0x30   :  { %493 = vmatprep.subr.bf16.mxu0 %v568_v61 }
  0x31   :  { %476 = vmatpush3.bf16.msra.mxu1 %v475_v51 }
  0x32   :  { %478 = vmatprep.subr.bf16.mxu1 %v477_v54 }
  0x33   :  { %495 = vmatpush3.bf16.msra.mxu0 %v494_v10 }
  0x34   :  { %496 = vmatprep.subr.bf16.mxu0 %v568_v61 }
  0x35   :  { %480 = vmatpush3.bf16.msra.mxu1 %v479_v57 }
  0x37   :  { %498 = vmatpush3.bf16.msra.mxu0 %v497_v13 }
  0x38   :  { %499 = vmatprep.subr.bf16.mxu0 %v568_v61 }
  0x3b   :  { %501 = vmatpush3.bf16.msra.mxu0 %v500_v16 }
  0x3c   :  { %502 = vmatprep.subr.bf16.mxu0 %v568_v61 }
  0x3f   :  { %504 = vmatpush3.bf16.msra.mxu0 %v503_v32 }
  0xef   :  { %v131_v24 = vpop.f32.mrb[0].mxu0 }
  0xf0   :  { %v132_v25 = vadd.f32 %v131_v24, %v47_v22  ;;  %v133_v26 = vpop.f32.mrb[1].mxu0 }
  0xf1   :  { %v134_v27 = vadd.f32 %v133_v26, %v51_v23 }
  0xf2   :  { %v136_v29 = vmax.f32 %v132_v25, 0.0 }
  0xf3   :  { %v137_v28 = vmax.f32 %v134_v27, 0.0 }
  0xf5   :  { %234 = vmatprep.mubr.f32.mxu1 %v137_v28 }
  0xf6   :  { %235 = vmatmul.mubr.f32.vlgmr.msra.gmra.mrb[0].mxu1 %v136_v29 }
 0x1c9   :  { %v390_v33 = vpop.f32.mrb[0].mxu1 }
 0x1ca   :  { %v391_v34 = vpop.f32.mrb[1].mxu1 }
 0x1cb   :  { %v392_v35 = vadd.f32 %v391_v34, %v390_v33 }
 0x1cd   :  { %v240_v36 = vmax.f32 %v392_v35, 0.0 }
 0x1cf   :  { %443 = vmatmul.mubr.f32.vlgmr.msra.gmra.mrb[2].mxu0 %v240_v36 }
 0x2a2   :  { %v323_v37 = vpop.f32.mrb[2].mxu0 }
 0x2a3   :  { %v444_v38 = vpop.f32.mrb[3].mxu0  ;;  %v328_v39 = vsel %vm327_vm3, %v323_v37, -inf }
 0x2a4   :  { %329 = vmax.xlane.f32.xlu0 %v328_v39 }
 0x331   :  { %v330_v40 = vpop.xlane.xlu0 %329 }
 0x332   :  { %v331_v41 = vsub.f32 %v323_v37, %v330_v40 }
 0x334   :  { %v332_v42 = vmul.f32 1.442695, %v331_v41 }
 0x336   :  { %512 = vpow2.f32 %v332_v42 }
 0x340   :  { %v513_v43 = vpop.eup %512 }
 0x341   :  { %v334_v44 = vsel %vm327_vm3, %v513_v43, 0.0 }
 0x342   :  { %335 = vadd.xlane.f32.xlu0 %v334_v44 }
 0x3cf   :  { %v336_v0 = vpop.xlane.xlu0 %335 }
 0x3d0   :  { %514 = vrcp.f32 %v336_v0 }
 0x3da   :  { %v515_v45 = vpop.eup %514 }
 0x3db   :  { %v338_v46 = vmul.f32 %v515_v45, %v513_v43 }
 0x3dd   :  { %339 = vst.msk [vmem:[#allocation5] sm:$0x3] %vm327_vm3, %v338_v46 }
 0x3de   :  { %549 = shalt.err (!%p546_p12)
}
 0x3df   :  { %s550_s27 = scalar_lea.hbm %s709_s5, 32 }
 0x3e0   :  { %p551_p13 = scmp.ne.s32.totalorder %s709_s5, %s550_s27  ;;  %p554_p0 = scmp.lt.u32.totalorder %s550_s27, %s709_s5 }
 0x3e2   :  { %p556_p1 = pnand %p554_p0, %p551_p13 }
 0x3e4   :  { %559 = shalt.err (!%p556_p1)
}
 0x3e5   :  { %349 = dma.vmem_to_hbm [thread:$0]  %s347_s4, 32, %s709_s5, [#allocation4]  }
 0x3e6   :  { %562 = dma.done.wait [#allocation4], 32  }
 0x3e7   :  { %563 = vsyncadd [#allocation4], 4294967264 }
 0x3e8   :  { %353 = vsyncpa [#allocation3], 1 }
 0x3e9   :  { %354 = vsyncpa [#allocation4], 1 }

</bundles_post_ra>
